<compile_context>
chip_gen: v7x
topology: tpu7x:2x2x1
jax: 0.10.0
libtpu: 0.0.40
codegen_flags: <defaults>
</compile_context>

<pallas_src>
import numpy as np
import jax
import jax.numpy as jnp
from jax.experimental import pallas as pl
from jax.experimental.pallas import tpu as pltpu


def _round_up(x, m):
    return (x + m - 1) // m * m


def mlp_base_kernel(xc_ref, w1_ref, b1_ref, w2_ref, b2_ref, w3_ref, b3_ref, out_ref):
    # xc: [TILE_N, num_inputs + cond_size]   (x | cond)
    xc = xc_ref[...]
    # layer 1 (critic + actor fused, lanes 0..h-1 = critic, h..2h-1 = actor)
    h1 = jnp.tanh(
        jnp.dot(xc, w1_ref[...], preferred_element_type=jnp.float32) + b1_ref[...]
    )
    # layer 2 (block-diagonal fuse)
    h2 = jnp.tanh(
        jnp.dot(h1, w2_ref[...], preferred_element_type=jnp.float32) + b2_ref[...]
    )
    # layer 3: lanes 0..h-1 = hidden_actor (identity block), lane h = value,
    # remaining lanes = 0.  Single lane-dense 128-wide store.
    out_ref[...] = (
        jnp.dot(h2, w3_ref[...], preferred_element_type=jnp.float32) + b3_ref[...]
    )


def mlp_base_forward(inputs, rnn_hxs, condition_state, params, tile_n=512):
    seq_len, batch, num_inputs = inputs.shape
    cond_size = condition_state.shape[-1]
    hidden = params["wc2"].shape[-1]
    N = seq_len * batch
    d_in = num_inputs + cond_size
    out_w = 2 * hidden  # 128 for hidden=64 -> lane-dense output tile

    # ---- flatten rows and fuse inputs: xc = [x | cond] ----
    x_flat = inputs.reshape(N, num_inputs)
    cond_flat = condition_state.reshape(N, cond_size)
    xc = jnp.concatenate([x_flat, cond_flat], axis=-1)

    # ---- build fused weights (constant-folded under jit) ----
    # W1 = [[Wc1, Wa1x], [0, Wa1c]]  -> xc @ W1 gives [critic_pre | actor_pre]
    w1 = jnp.zeros((d_in, 2 * hidden), jnp.float32)
    w1 = w1.at[:num_inputs, :hidden].set(params["wc1"])
    w1 = w1.at[:num_inputs, hidden:].set(params["wa1x"])
    w1 = w1.at[num_inputs:, hidden:].set(params["wa1c"])
    b1 = jnp.concatenate([params["bc1"], params["ba1"]], axis=-1)

    # W2 = diag(Wc2, Wa2)
    w2 = jnp.zeros((2 * hidden, 2 * hidden), jnp.float32)
    w2 = w2.at[:hidden, :hidden].set(params["wc2"])
    w2 = w2.at[hidden:, hidden:].set(params["wa2"])
    b2 = jnp.concatenate([params["bc2"], params["ba2"]], axis=-1)

    # W3: lanes 0..h-1 select hidden_actor, lane h = hidden_critic @ Wcl (+ bcl)
    w3 = jnp.zeros((2 * hidden, out_w), jnp.float32)
    w3 = w3.at[hidden:, :hidden].set(jnp.eye(hidden, dtype=jnp.float32))
    w3 = w3.at[:hidden, hidden:hidden + 1].set(params["wcl"])
    b3 = jnp.zeros((1, out_w), jnp.float32)
    b3 = b3.at[:, hidden:hidden + 1].set(params["bcl"])

    # ---- tile over rows; pad N up to a multiple of the row tile ----
    tile_n = min(tile_n, _round_up(N, 8))
    n_pad = _round_up(N, tile_n)
    if n_pad != N:
        xc = jnp.pad(xc, ((0, n_pad - N), (0, 0)))
    grid = (n_pad // tile_n,)

    row_in_spec = pl.BlockSpec((tile_n, d_in), lambda i: (i, 0))
    row_out_spec = pl.BlockSpec((tile_n, out_w), lambda i: (i, 0))

    def const_spec(shape):
        return pl.BlockSpec(shape, lambda i: (0, 0))

    out = pl.pallas_call(
        mlp_base_kernel,
        out_shape=jax.ShapeDtypeStruct((n_pad, out_w), jnp.float32),
        grid=grid,
        in_specs=[
            row_in_spec,
            const_spec((d_in, 2 * hidden)), const_spec((1, 2 * hidden)),
            const_spec((2 * hidden, 2 * hidden)), const_spec((1, 2 * hidden)),
            const_spec((2 * hidden, out_w)), const_spec((1, out_w)),
        ],
        out_specs=row_out_spec,
        compiler_params=pltpu.CompilerParams(
            dimension_semantics=("parallel",),
            vmem_limit_bytes=64 * 1024 * 1024,
        ),
    )(xc, w1, b1, w2, b2, w3, b3)

    out = out[:N]
    hidden_actor = out[:, :hidden].reshape(seq_len, batch, hidden)
    value = out[:, hidden:hidden + 1].reshape(seq_len, batch, 1)
    return value, hidden_actor, rnn_hxs


def init_params(key, num_inputs, cond_size, hidden=64):
    """Orthogonal(gain=sqrt(2)) weights, zero biases. Weights stored [in, out]."""
    gain = float(np.sqrt(2.0))
    ortho = jax.nn.initializers.orthogonal(scale=gain)
    ks = jax.random.split(key, 6)

    # actor layer 1 takes the concatenation [condition_state, x]
    wa1_full = ortho(ks[0], (cond_size + num_inputs, hidden), jnp.float32)
    params = {
        "wa1c": wa1_full[:cond_size, :],
        "wa1x": wa1_full[cond_size:, :],
        "ba1": jnp.zeros((1, hidden), jnp.float32),
        "wa2": ortho(ks[1], (hidden, hidden), jnp.float32),
        "ba2": jnp.zeros((1, hidden), jnp.float32),
        "wc1": ortho(ks[2], (num_inputs, hidden), jnp.float32),
        "bc1": jnp.zeros((1, hidden), jnp.float32),
        "wc2": ortho(ks[3], (hidden, hidden), jnp.float32),
        "bc2": jnp.zeros((1, hidden), jnp.float32),
        "wcl": ortho(ks[4], (hidden, 1), jnp.float32),
        "bcl": jnp.zeros((1, 1), jnp.float32),
    }
    return params


def mlp_base_reference(inputs, rnn_hxs, condition_state, params):
    """Pure-JAX reference mirroring the PyTorch forward."""
    x = inputs
    hc = jnp.tanh(jnp.tanh(x @ params["wc1"] + params["bc1"]) @ params["wc2"] + params["bc2"])
    value = hc @ params["wcl"] + params["bcl"]
    concat = jnp.concatenate([condition_state, x], axis=-1)
    wa1 = jnp.concatenate([params["wa1c"], params["wa1x"]], axis=0)
    ha = jnp.tanh(jnp.tanh(concat @ wa1 + params["ba1"]) @ params["wa2"] + params["ba2"])
    return value, ha, rnn_hxs


def _check(seq_len, batch, num_inputs, cond_size, hidden, key):
    k_in, k_cond, k_par = jax.random.split(key, 3)
    inputs = jax.random.normal(k_in, (seq_len, batch, num_inputs), jnp.float32)
    condition_state = jax.random.normal(k_cond, (seq_len, batch, cond_size), jnp.float32)
    # recurrent=False -> recurrent_hidden_state_size == 1; hxs passes through untouched.
    rnn_hxs = jnp.zeros((batch, 1), jnp.float32)
    params = init_params(k_par, num_inputs, cond_size, hidden)

    value, hidden_actor, out_hxs = mlp_base_forward(inputs, rnn_hxs, condition_state, params)
    jax.block_until_ready((value, hidden_actor, out_hxs))

    v_ref, a_ref, h_ref = mlp_base_reference(inputs, rnn_hxs, condition_state, params)
    np.testing.assert_allclose(np.asarray(value), np.asarray(v_ref), atol=1e-5, rtol=1e-5)
    np.testing.assert_allclose(np.asarray(hidden_actor), np.asarray(a_ref), atol=1e-5, rtol=1e-5)
    np.testing.assert_allclose(np.asarray(out_hxs), np.asarray(h_ref), atol=0, rtol=0)

    assert value.shape == (seq_len, batch, 1)
    assert hidden_actor.shape == (seq_len, batch, hidden)
    assert out_hxs.shape == (batch, 1)


if __name__ == "__main__":
    key = jax.random.PRNGKey(0)
    k1, k2 = jax.random.split(key)

    # Small shapes consistent with the module (single-tile grid).
    _check(seq_len=8, batch=2, num_inputs=32, cond_size=16, hidden=64, key=k1)
    # Larger N to exercise multi-tile grid + row padding (N=1200 -> 3 tiles of 512).
    _check(seq_len=300, batch=4, num_inputs=32, cond_size=16, hidden=64, key=k2)

    print("KERNEL_OK")
</pallas_src>

<mosaic_0001>
module attributes {stable_mosaic.version = 11 : i64} {
  func.func @mlp_base_kernel(%arg0: i32, %arg1: memref<16x48xf32, #tpu.memory_space<vmem>>, %arg2: memref<48x128xf32, #tpu.memory_space<vmem>>, %arg3: memref<1x128xf32, #tpu.memory_space<vmem>>, %arg4: memref<128x128xf32, #tpu.memory_space<vmem>>, %arg5: memref<1x128xf32, #tpu.memory_space<vmem>>, %arg6: memref<128x128xf32, #tpu.memory_space<vmem>>, %arg7: memref<1x128xf32, #tpu.memory_space<vmem>>, %arg8: memref<16x128xf32, #tpu.memory_space<vmem>>) attributes {dimension_semantics = [#tpu.dimension_semantics<parallel>], iteration_bounds = array<i64: 1>, scalar_prefetch = 0 : i64, scratch_operands = 0 : i64, tpu.core_type = #tpu.core_type<tc>, window_params = [{transform_indices = @transform_0, window_bounds = array<i64: 16, 48>}, {pipeline_mode = #tpu.pipeline_mode<synchronous>, transform_indices = @transform_1, window_bounds = array<i64: 48, 128>}, {pipeline_mode = #tpu.pipeline_mode<synchronous>, transform_indices = @transform_2, window_bounds = array<i64: 1, 128>}, {pipeline_mode = #tpu.pipeline_mode<synchronous>, transform_indices = @transform_3, window_bounds = array<i64: 128, 128>}, {pipeline_mode = #tpu.pipeline_mode<synchronous>, transform_indices = @transform_4, window_bounds = array<i64: 1, 128>}, {pipeline_mode = #tpu.pipeline_mode<synchronous>, transform_indices = @transform_5, window_bounds = array<i64: 128, 128>}, {pipeline_mode = #tpu.pipeline_mode<synchronous>, transform_indices = @transform_6, window_bounds = array<i64: 1, 128>}, {transform_indices = @transform_7, window_bounds = array<i64: 16, 128>}]} {
    %c0 = arith.constant 0 : index
    %c0_0 = arith.constant 0 : index
    %0 = vector.load %arg1[%c0, %c0_0] : memref<16x48xf32, #tpu.memory_space<vmem>>, vector<16x48xf32>
    %c0_1 = arith.constant 0 : index
    %c0_2 = arith.constant 0 : index
    %1 = vector.load %arg2[%c0_1, %c0_2] : memref<48x128xf32, #tpu.memory_space<vmem>>, vector<48x128xf32>
    %cst = arith.constant dense<0.000000e+00> : vector<16x128xf32>
    %2 = tpu.matmul %0, %1, %cst {dimension_numbers = #tpu.dot_dimension_numbers<[1], [0], [0], [1], [0, 0, 1, 1], [], []>} : vector<16x48xf32>, vector<48x128xf32>, vector<16x128xf32> -> vector<16x128xf32>
    %c0_3 = arith.constant 0 : index
    %c0_4 = arith.constant 0 : index
    %3 = vector.load %arg3[%c0_3, %c0_4] : memref<1x128xf32, #tpu.memory_space<vmem>>, vector<1x128xf32>
    %4 = vector.broadcast %3 : vector<1x128xf32> to vector<16x128xf32>
    %5 = arith.addf %2, %4 : vector<16x128xf32>
    %6 = math.tanh %5 : vector<16x128xf32>
    %c0_5 = arith.constant 0 : index
    %c0_6 = arith.constant 0 : index
    %7 = vector.load %arg4[%c0_5, %c0_6] : memref<128x128xf32, #tpu.memory_space<vmem>>, vector<128x128xf32>
    %cst_7 = arith.constant dense<0.000000e+00> : vector<16x128xf32>
    %8 = tpu.matmul %6, %7, %cst_7 {dimension_numbers = #tpu.dot_dimension_numbers<[1], [0], [0], [1], [0, 0, 1, 1], [], []>} : vector<16x128xf32>, vector<128x128xf32>, vector<16x128xf32> -> vector<16x128xf32>
    %c0_8 = arith.constant 0 : index
    %c0_9 = arith.constant 0 : index
    %9 = vector.load %arg5[%c0_8, %c0_9] : memref<1x128xf32, #tpu.memory_space<vmem>>, vector<1x128xf32>
    %10 = vector.broadcast %9 : vector<1x128xf32> to vector<16x128xf32>
    %11 = arith.addf %8, %10 : vector<16x128xf32>
    %12 = math.tanh %11 : vector<16x128xf32>
    %c0_10 = arith.constant 0 : index
    %c0_11 = arith.constant 0 : index
    %13 = vector.load %arg6[%c0_10, %c0_11] : memref<128x128xf32, #tpu.memory_space<vmem>>, vector<128x128xf32>
    %cst_12 = arith.constant dense<0.000000e+00> : vector<16x128xf32>
    %14 = tpu.matmul %12, %13, %cst_12 {dimension_numbers = #tpu.dot_dimension_numbers<[1], [0], [0], [1], [0, 0, 1, 1], [], []>} : vector<16x128xf32>, vector<128x128xf32>, vector<16x128xf32> -> vector<16x128xf32>
    %c0_13 = arith.constant 0 : index
    %c0_14 = arith.constant 0 : index
    %15 = vector.load %arg7[%c0_13, %c0_14] : memref<1x128xf32, #tpu.memory_space<vmem>>, vector<1x128xf32>
    %16 = vector.broadcast %15 : vector<1x128xf32> to vector<16x128xf32>
    %17 = arith.addf %14, %16 : vector<16x128xf32>
    %c0_15 = arith.constant 0 : index
    %c0_16 = arith.constant 0 : index
    %18 = vector.load %arg8[%c0_15, %c0_16] : memref<16x128xf32, #tpu.memory_space<vmem>>, vector<16x128xf32>
    tpu.vector_store %arg8[%c0_15, %c0_16], %17 {strides = array<i32>} : memref<16x128xf32, #tpu.memory_space<vmem>>, vector<16x128xf32>,
    return
  }
  func.func @transform_0(%arg0: i32) -> (i32, i32) {
    %c0_i32 = arith.constant 0 : i32
    %c0_i32_0 = arith.constant 0 : i32
    return %arg0, %c0_i32 : i32, i32
  }
  func.func @transform_1(%arg0: i32) -> (i32, i32) {
    %c0_i32 = arith.constant 0 : i32
    %c0_i32_0 = arith.constant 0 : i32
    %c0_i32_1 = arith.constant 0 : i32
    return %c0_i32, %c0_i32_0 : i32, i32
  }
  func.func @transform_2(%arg0: i32) -> (i32, i32) {
    %c0_i32 = arith.constant 0 : i32
    %c0_i32_0 = arith.constant 0 : i32
    %c0_i32_1 = arith.constant 0 : i32
    return %c0_i32, %c0_i32_0 : i32, i32
  }
  func.func @transform_3(%arg0: i32) -> (i32, i32) {
    %c0_i32 = arith.constant 0 : i32
    %c0_i32_0 = arith.constant 0 : i32
    %c0_i32_1 = arith.constant 0 : i32
    return %c0_i32, %c0_i32_0 : i32, i32
  }
  func.func @transform_4(%arg0: i32) -> (i32, i32) {
    %c0_i32 = arith.constant 0 : i32
    %c0_i32_0 = arith.constant 0 : i32
    %c0_i32_1 = arith.constant 0 : i32
    return %c0_i32, %c0_i32_0 : i32, i32
  }
  func.func @transform_5(%arg0: i32) -> (i32, i32) {
    %c0_i32 = arith.constant 0 : i32
    %c0_i32_0 = arith.constant 0 : i32
    %c0_i32_1 = arith.constant 0 : i32
    return %c0_i32, %c0_i32_0 : i32, i32
  }
  func.func @transform_6(%arg0: i32) -> (i32, i32) {
    %c0_i32 = arith.constant 0 : i32
    %c0_i32_0 = arith.constant 0 : i32
    %c0_i32_1 = arith.constant 0 : i32
    return %c0_i32, %c0_i32_0 : i32, i32
  }
  func.func @transform_7(%arg0: i32) -> (i32, i32) {
    %c0_i32 = arith.constant 0 : i32
    %c0_i32_0 = arith.constant 0 : i32
    return %arg0, %c0_i32 : i32, i32
  }
}

</mosaic_0001>

<bundles_post_ra>
// kernel: tpu_custom_call.1
= control target key start
LH: loop header
LB: loop body
LE: loop exit
PB: predicated region body
PF: predicated region fallthrough
CT: control target
= control target key end

     0   :  { %12 = vsyncpa [#allocation3], 0  ;;  %s1026_s0 = inlined_call_operand.hbm [shape: f32[16,48], index: 0, kind: input, shape index: {}]   ;;  %s1027_s1 = inlined_call_operand.hbm [shape: f32[48,128], index: 1, kind: input, shape index: {}]   ;;  %s1028_s2 = inlined_call_operand.hbm [shape: f32[1,128], index: 2, kind: input, shape index: {}]   ;;  %s1029_s3 = inlined_call_operand.hbm [shape: f32[128,128], index: 3, kind: input, shape index: {}]   ;;  %s1030_s4 = inlined_call_operand.hbm [shape: f32[1,128], index: 4, kind: input, shape index: {}]   ;;  %s1031_s5 = inlined_call_operand.hbm [shape: f32[128,128], index: 5, kind: input, shape index: {}]   ;;  %s1032_s6 = inlined_call_operand.hbm [shape: f32[1,128], index: 6, kind: input, shape index: {}]   ;;  %s1033_s7 = inlined_call_operand.hbm [shape: f32[16,128], index: 7, kind: output, shape index: {}]  }
   0x1   :  { %13 = vsyncpa [#allocation6], 0 }
   0x2   :  { %14 = vsyncpa [#allocation9], 0 }
   0x3   :  { %15 = vsyncpa [#allocation12], 0 }
   0x4   :  { %16 = vsyncpa [#allocation4], 0  ;;  %s849_s24 = smov [#allocation5]   ;;  %s850_s26 = smov [#allocation8]  }
   0x5   :  { %s34_s25 = sshll.u32 %s849_s24, 4  ;;  %s56_s27 = sshll.u32 %s850_s26, 4  ;;  %s35_s25 = int_to_ptr.vmem [resolvable:$true] %s34_s25  ;;  %s899_s27 = int_to_ptr.vmem [resolvable:$true] %s56_s27 }
   0x6   :  { %s663_s30 = scalar_lea.hbm %s1027_s1, 768 }
   0x7   :  { %p664_p0 = scmp.ne.s32.totalorder %s1027_s1, %s663_s30  ;;  %p667_p1 = scmp.lt.u32.totalorder %s663_s30, %s1027_s1 }
   0x9   :  { %p669_p2 = pnand %p667_p1, %p664_p0 }
   0xb   :  { %672 = shalt.err (!%p669_p2)
}
   0xc   :  { %s673_s12 = scalar_lea.vmem %s35_s25, 768  ;;  %p678_p4 = scmp.lt.s32.totalorder %s35_s25, %s35_s25 }
   0xd   :  { %p674_p3 = scmp.ne.s32.totalorder %s35_s25, %s673_s12  ;;  %p679_p5 = scmp.lt.s32.totalorder %s673_s12, %s673_s12 }
   0xf   :  { %p680_p6 = por %p679_p5, %p678_p4 }
  0x11   :  { %p681_p7 = pnand %p680_p6, %p674_p3 }
  0x13   :  { %684 = shalt.err (!%p681_p7)
}
  0x14   :  { %s851_s13 = smov 128   ;;  %s852_s14 = smov 8  }
  0x15   :  { %40 = dma.hbm_to_vmem [thread:$0]  %s1027_s1, 768, %s35_s25, [#allocation6], %s851_s13, %s851_s13, %s852_s14  }
  0x16   :  { %s685_s19 = scalar_lea.hbm %s1029_s3, 2048 }
  0x17   :  { %p686_p8 = scmp.ne.s32.totalorder %s1029_s3, %s685_s19  ;;  %p689_p9 = scmp.lt.u32.totalorder %s685_s19, %s1029_s3 }
  0x19   :  { %p691_p10 = pnand %p689_p9, %p686_p8 }
  0x1b   :  { %694 = shalt.err (!%p691_p10)
}
  0x1c   :  { %s695_s24 = scalar_lea.vmem %s899_s27, 2048  ;;  %p700_p12 = scmp.lt.s32.totalorder %s899_s27, %s899_s27 }
  0x1d   :  { %p696_p11 = scmp.ne.s32.totalorder %s899_s27, %s695_s24  ;;  %p701_p13 = scmp.lt.s32.totalorder %s695_s24, %s695_s24 }
  0x1f   :  { %p702_p0 = por %p701_p13, %p700_p12 }
  0x21   :  { %p703_p1 = pnand %p702_p0, %p696_p11 }
  0x23   :  { %706 = shalt.err (!%p703_p1)
}
  0x24   :  { %62 = dma.hbm_to_vmem [thread:$0]  %s1029_s3, 2048, %s899_s27, [#allocation9], %s851_s13, %s851_s13, %s852_s14  }
  0x25   :  { %s853_s26 = smov [#allocation11]   ;;  %s854_s29 = smov [#allocation2]  }
  0x26   :  { %s78_s28 = sshll.u32 %s853_s26, 4  ;;  %s22_s30 = sshll.u32 %s854_s29, 4  ;;  %s79_s28 = int_to_ptr.vmem [resolvable:$true] %s78_s28  ;;  %s936_s30 = int_to_ptr.vmem [resolvable:$true] %s22_s30 }
  0x27   :  { %s707_s10 = scalar_lea.hbm %s1031_s5, 2048 }
  0x28   :  { %p708_p2 = scmp.ne.s32.totalorder %s1031_s5, %s707_s10  ;;  %p711_p3 = scmp.lt.u32.totalorder %s707_s10, %s1031_s5 }
  0x2a   :  { %p713_p4 = pnand %p711_p3, %p708_p2 }
  0x2c   :  { %716 = shalt.err (!%p713_p4)
}
  0x2d   :  { %s717_s3 = scalar_lea.vmem %s79_s28, 2048  ;;  %p722_p6 = scmp.lt.s32.totalorder %s79_s28, %s79_s28 }
  0x2e   :  { %p718_p5 = scmp.ne.s32.totalorder %s79_s28, %s717_s3  ;;  %p723_p7 = scmp.lt.s32.totalorder %s717_s3, %s717_s3 }
  0x30   :  { %p724_p8 = por %p723_p7, %p722_p6 }
  0x32   :  { %p725_p9 = pnand %p724_p8, %p718_p5 }
  0x34   :  { %728 = shalt.err (!%p725_p9)
}
  0x35   :  { %84 = dma.hbm_to_vmem [thread:$0]  %s1031_s5, 2048, %s79_s28, [#allocation12], %s851_s13, %s851_s13, %s852_s14  }
  0x36   :  { %s729_s20 = scalar_lea.hbm %s1026_s0, 256 }
  0x37   :  { %p730_p10 = scmp.ne.s32.totalorder %s1026_s0, %s729_s20  ;;  %p733_p11 = scmp.lt.u32.totalorder %s729_s20, %s1026_s0 }
  0x39   :  { %p735_p12 = pnand %p733_p11, %p730_p10 }
  0x3b   :  { %738 = shalt.err (!%p735_p12)
}
  0x3c   :  { %s739_s1 = scalar_lea.vmem %s936_s30, 256  ;;  %p744_p0 = scmp.lt.s32.totalorder %s936_s30, %s936_s30 }
  0x3d   :  { %p740_p13 = scmp.ne.s32.totalorder %s936_s30, %s739_s1  ;;  %p745_p1 = scmp.lt.s32.totalorder %s739_s1, %s739_s1 }
  0x3f   :  { %p746_p2 = por %p745_p1, %p744_p0 }
  0x41   :  { %p747_p3 = pnand %p746_p2, %p740_p13 }
  0x43   :  { %750 = shalt.err (!%p747_p3)
}
  0x44   :  { %28 = dma.hbm_to_vmem [thread:$0]  %s1026_s0, 256, %s936_s30, [#allocation3], %s851_s13, %s851_s13, %s852_s14  }
  0x45   :  { %s855_s26 = smov [#allocation7]   ;;  %s856_s29 = smov [#allocation10]  }
  0x46   :  { %s47_s28 = sshll.u32 %s855_s26, 4  ;;  %s69_s8 = sshll.u32 %s856_s29, 4  ;;  %s48_s28 = int_to_ptr.vmem [resolvable:$true] %s47_s28  ;;  %s70_s8 = int_to_ptr.vmem [resolvable:$true] %s69_s8 }
  0x47   :  { %s751_s11 = scalar_lea.hbm %s1028_s2, 16 }
  0x48   :  { %p752_p4 = scmp.ne.s32.totalorder %s1028_s2, %s751_s11  ;;  %p755_p5 = scmp.lt.u32.totalorder %s751_s11, %s1028_s2 }
  0x4a   :  { %p757_p6 = pnand %p755_p5, %p752_p4 }
  0x4c   :  { %760 = shalt.err (!%p757_p6)
}
  0x4d   :  { %s761_s0 = scalar_lea.vmem %s48_s28, 16  ;;  %s765_s30 = scalar_lea.vmem %s48_s28, 32 }
  0x4e   :  { %p762_p7 = scmp.ne.s32.totalorder %s48_s28, %s761_s0  ;;  %p766_p8 = scmp.lt.s32.totalorder %s48_s28, %s48_s28 }
  0x4f   :  { %p767_p9 = scmp.lt.s32.totalorder %s765_s30, %s761_s0 }
  0x51   :  { %p768_p10 = por %p767_p9, %p766_p8 }
  0x53   :  { %p769_p11 = pnand %p768_p10, %p762_p7 }
  0x55   :  { %772 = shalt.err (!%p769_p11)
}
  0x56   :  { %50 = dma.hbm_to_vmem [thread:$0]  %s1028_s2, 16, %s48_s28, [#allocation6]  }
  0x57   :  { %s773_s20 = scalar_lea.hbm %s1030_s4, 16 }
  0x58   :  { %p774_p12 = scmp.ne.s32.totalorder %s1030_s4, %s773_s20  ;;  %p777_p13 = scmp.lt.u32.totalorder %s773_s20, %s1030_s4 }
  0x5a   :  { %p779_p0 = pnand %p777_p13, %p774_p12 }
  0x5c   :  { %782 = shalt.err (!%p779_p0)
}
  0x5d   :  { %s783_s1 = scalar_lea.vmem %s70_s8, 16  ;;  %s787_s5 = scalar_lea.vmem %s70_s8, 32 }
  0x5e   :  { %p784_p1 = scmp.ne.s32.totalorder %s70_s8, %s783_s1  ;;  %p788_p2 = scmp.lt.s32.totalorder %s70_s8, %s70_s8 }
  0x5f   :  { %p789_p3 = scmp.lt.s32.totalorder %s787_s5, %s783_s1 }
  0x61   :  { %p790_p4 = por %p789_p3, %p788_p2 }
  0x63   :  { %p791_p5 = pnand %p790_p4, %p784_p1 }
  0x65   :  { %794 = shalt.err (!%p791_p5)
}
  0x66   :  { %72 = dma.hbm_to_vmem [thread:$0]  %s1030_s4, 16, %s70_s8, [#allocation9]  }
  0x67   :  { %s857_s26 = smov [#allocation13]   ;;  %s795_s10 = scalar_lea.hbm %s1032_s6, 16 }
  0x68   :  { %s91_s28 = sshll.u32 %s857_s26, 4  ;;  %p796_p6 = scmp.ne.s32.totalorder %s1032_s6, %s795_s10  ;;  %s92_s28 = int_to_ptr.vmem [resolvable:$true] %s91_s28 }
  0x69   :  { %p799_p7 = scmp.lt.u32.totalorder %s795_s10, %s1032_s6 }
  0x6b   :  { %p801_p8 = pnand %p799_p7, %p796_p6 }
  0x6d   :  { %804 = shalt.err (!%p801_p8)
}
  0x6e   :  { %s805_s3 = scalar_lea.vmem %s92_s28, 16  ;;  %s809_s4 = scalar_lea.vmem %s92_s28, 32 }
  0x6f   :  { %p806_p9 = scmp.ne.s32.totalorder %s92_s28, %s805_s3  ;;  %p810_p10 = scmp.lt.s32.totalorder %s92_s28, %s92_s28 }
  0x70   :  { %p811_p11 = scmp.lt.s32.totalorder %s809_s4, %s805_s3 }
  0x72   :  { %p812_p12 = por %p811_p11, %p810_p10 }
  0x74   :  { %p813_p13 = pnand %p812_p12, %p806_p9 }
  0x76   :  { %816 = shalt.err (!%p813_p13)
}
  0x77   :  { %94 = dma.hbm_to_vmem [thread:$0]  %s1032_s6, 16, %s92_s28, [#allocation12]  }
  0x78   :  { %839 = dma.done.wait [#allocation3], 256  }
  0x79   :  { %840 = vsyncadd [#allocation3], 4294967040 }
  0x7a   :  { %841 = dma.done.wait [#allocation6], 784  }
  0x7b   :  { %842 = vsyncadd [#allocation6], 4294966512 }
  0x7c   :  { %843 = dma.done.wait [#allocation9], 2064  }
  0x7d   :  { %844 = vsyncadd [#allocation9], 4294965232 }
  0x7e   :  { %845 = dma.done.wait [#allocation12], 2064  }
  0x7f   :  { %846 = vsyncadd [#allocation12], 4294965232  ;;  %v118_v0 = vld [vmem:[#allocation5] sm:$0xff]  ;;  %v119_v1 = vld [vmem:[#allocation5 + $0x8] sm:$0xff]  ;;  %vm131_vm0 = vcmask 392192   ;;  %s858_s6 = smov [#allocation14]  }
  0x80   :  { %v120_v2 = vld [vmem:[#allocation5 + $0x10] sm:$0xff]  ;;  %v569_v3 = vpack.c.bf16 %v119_v1, %v118_v0  ;;  %v121_v4 = vld [vmem:[#allocation5 + $0x18] sm:$0xff]  ;;  %v122_v5 = vld [vmem:[#allocation5 + $0x20] sm:$0xff]  ;;  %s420_s30 = sshll.u32 %s858_s6, 4  ;;  %s421_s30 = int_to_ptr.vmem [resolvable:$true] %s420_s30 }
  0x81   :  { %v573_v6 = vpack.c.bf16 %v121_v4, %v120_v2  ;;  %v123_v7 = vld [vmem:[#allocation5 + $0x28] sm:$0xff]  ;;  %v116_v8 = vld [vmem:[#allocation2] sm:$0xff]  ;;  %v216_v10 = vld [vmem:[#allocation8 + $0x8] sm:$0xff]  ;;  %s817_s27 = scalar_lea.vmem %s421_s30, 256  ;;  %p822_p1 = scmp.lt.s32.totalorder %s421_s30, %s421_s30 }
  0x82   :  { %v215_v9 = vld [vmem:[#allocation8] sm:$0xff]  ;;  %570 = vmatprep.subr.bf16.mxu0 %v569_v3  ;;  %496 = vmatprep.mubr.msk.f32.mxu0 %vm131_vm0, %v116_v8  ;;  %v217_v11 = vld [vmem:[#allocation8 + $0x10] sm:$0xff]  ;;  %v218_v12 = vld [vmem:[#allocation8 + $0x18] sm:$0xff]  ;;  %v577_v15 = vpack.c.bf16 %v123_v7, %v122_v5  ;;  %p818_p0 = scmp.ne.s32.totalorder %s421_s30, %s817_s27  ;;  %p823_p2 = scmp.lt.s32.totalorder %s817_s27, %s817_s27 }
  0x83   :  { %572 = vmatpush3.bf16.msra.mxu0 %v569_v3  ;;  %v581_v13 = vpack.c.bf16 %v216_v10, %v215_v9  ;;  %v585_v14 = vpack.c.bf16 %v218_v12, %v217_v11  ;;  %v219_v16 = vld [vmem:[#allocation8 + $0x20] sm:$0xff]  ;;  %v220_v17 = vld [vmem:[#allocation8 + $0x28] sm:$0xff]  ;;  %v221_v19 = vld [vmem:[#allocation8 + $0x30] sm:$0xff] }
  0x84   :  { %574 = vmatprep.subr.bf16.mxu0 %v573_v6  ;;  %v589_v18 = vpack.c.bf16 %v220_v17, %v219_v16  ;;  %v222_v20 = vld [vmem:[#allocation8 + $0x38] sm:$0xff]  ;;  %v117_v21 = vld [vmem:[#allocation2 + $0x8] sm:$0xff]  ;;  %v225_v26 = vld [vmem:[#allocation8 + $0x50] sm:$0xff]  ;;  %p824_p3 = por %p823_p2, %p822_p1 }
  0x85   :  { %582 = vmatprep.subr.bf16.mxu1 %v581_v13  ;;  %v593_v22 = vpack.c.bf16 %v222_v20, %v221_v19  ;;  %v223_v23 = vld [vmem:[#allocation8 + $0x40] sm:$0xff]  ;;  %v224_v24 = vld [vmem:[#allocation8 + $0x48] sm:$0xff]  ;;  %v226_v27 = vld [vmem:[#allocation8 + $0x58] sm:$0xff] }
  0x86   :  { %584 = vmatpush3.bf16.msra.mxu1 %v581_v13  ;;  %v597_v25 = vpack.c.bf16 %v224_v24, %v223_v23  ;;  %v601_v28 = vpack.c.bf16 %v226_v27, %v225_v26  ;;  %v227_v29 = vld [vmem:[#allocation8 + $0x60] sm:$0xff]  ;;  %v228_v30 = vld [vmem:[#allocation8 + $0x68] sm:$0xff]  ;;  %v229_v31 = vld [vmem:[#allocation8 + $0x70] sm:$0xff]  ;;  %p825_p4 = pnand %p824_p3, %p818_p0 }
  0x87   :  { %576 = vmatpush3.bf16.msra.mxu0 %v573_v6  ;;  %586 = vmatprep.subr.bf16.mxu1 %v585_v14  ;;  %v605_v32 = vpack.c.bf16 %v228_v30, %v227_v29  ;;  %v230_v33 = vld [vmem:[#allocation8 + $0x78] sm:$0xff]  ;;  %v315_v35 = vld [vmem:[#allocation11] sm:$0xff]  ;;  %v316_v36 = vld [vmem:[#allocation11 + $0x8] sm:$0xff] }
  0x88   :  { %578 = vmatprep.subr.bf16.mxu0 %v577_v15  ;;  %v609_v34 = vpack.c.bf16 %v230_v33, %v229_v31  ;;  %v317_v37 = vld [vmem:[#allocation11 + $0x10] sm:$0xff]  ;;  %v613_v38 = vpack.c.bf16 %v316_v36, %v315_v35  ;;  %v318_v39 = vld [vmem:[#allocation11 + $0x18] sm:$0xff]  ;;  %v319_v41 = vld [vmem:[#allocation11 + $0x20] sm:$0xff] }
  0x89   :  { %v617_v40 = vpack.c.bf16 %v318_v39, %v317_v37  ;;  %v320_v42 = vld [vmem:[#allocation11 + $0x28] sm:$0xff]  ;;  %v321_v44 = vld [vmem:[#allocation11 + $0x30] sm:$0xff]  ;;  %v322_v45 = vld [vmem:[#allocation11 + $0x38] sm:$0xff] }
  0x8a   :  { %588 = vmatpush3.bf16.msra.mxu1 %v585_v14  ;;  %v621_v43 = vpack.c.bf16 %v320_v42, %v319_v41  ;;  %v625_v46 = vpack.c.bf16 %v322_v45, %v321_v44  ;;  %v435_v47 = vld [vmem:[#allocation7] ss:$0 sm:$0xff]  ;;  %v323_v54 = vld [vmem:[#allocation11 + $0x40] sm:$0xff]  ;;  %v324_v55 = vld [vmem:[#allocation11 + $0x48] sm:$0xff] }
  0x8b   :  { %580 = vmatpush3.bf16.msra.mxu0 %v577_v15  ;;  %590 = vmatprep.subr.bf16.mxu1 %v589_v18  ;;  %v629_v56 = vpack.c.bf16 %v324_v55, %v323_v54  ;;  %v325_v57 = vld [vmem:[#allocation11 + $0x50] sm:$0xff]  ;;  %v326_v58 = vld [vmem:[#allocation11 + $0x58] sm:$0xff]  ;;  %v327_v60 = vld [vmem:[#allocation11 + $0x60] sm:$0xff] }
  0x8c   :  { %614 = vmatprep.subr.bf16.mxu0 %v613_v38  ;;  %v633_v59 = vpack.c.bf16 %v326_v58, %v325_v57  ;;  %v328_v61 = vld [vmem:[#allocation11 + $0x68] sm:$0xff]  ;;  %v329_v62 = vld [vmem:[#allocation11 + $0x70] sm:$0xff]  ;;  %v330_v0 = vld [vmem:[#allocation11 + $0x78] sm:$0xff] }
  0x8d   :  { %v637_v63 = vpack.c.bf16 %v328_v61, %v327_v60  ;;  %v641_v1 = vpack.c.bf16 %v330_v0, %v329_v62  ;;  %v438_v2 = vld [vmem:[#allocation10] ss:$0 sm:$0xff]  ;;  %v439_v9 = vld [vmem:[#allocation13] ss:$0 sm:$0xff] }
  0x8e   :  { %497 = vmatmul.mubr.msk.f32.vlgmr.msra.gmra.mrb[0].mxu0 %vm131_vm0, %v117_v21  ;;  %592 = vmatpush3.bf16.msra.mxu1 %v589_v18 }
  0x8f   :  { %594 = vmatprep.subr.bf16.mxu1 %v593_v22  ;;  %616 = vmatpush3.bf16.msra.mxu0 %v613_v38 }
  0x90   :  { %618 = vmatprep.subr.bf16.mxu0 %v617_v40 }
  0x92   :  { %596 = vmatpush3.bf16.msra.mxu1 %v593_v22 }
  0x93   :  { %598 = vmatprep.subr.bf16.mxu1 %v597_v25  ;;  %620 = vmatpush3.bf16.msra.mxu0 %v617_v40 }
  0x94   :  { %622 = vmatprep.subr.bf16.mxu0 %v621_v43 }
  0x96   :  { %600 = vmatpush3.bf16.msra.mxu1 %v597_v25 }
  0x97   :  { %602 = vmatprep.subr.bf16.mxu1 %v601_v28  ;;  %624 = vmatpush3.bf16.msra.mxu0 %v621_v43 }
  0x98   :  { %626 = vmatprep.subr.bf16.mxu0 %v625_v46 }
  0x9a   :  { %604 = vmatpush3.bf16.msra.mxu1 %v601_v28 }
  0x9b   :  { %606 = vmatprep.subr.bf16.mxu1 %v605_v32  ;;  %628 = vmatpush3.bf16.msra.mxu0 %v625_v46 }
  0x9c   :  { %630 = vmatprep.subr.bf16.mxu0 %v629_v56 }
  0x9e   :  { %608 = vmatpush3.bf16.msra.mxu1 %v605_v32 }
  0x9f   :  { %610 = vmatprep.subr.bf16.mxu1 %v609_v34  ;;  %632 = vmatpush3.bf16.msra.mxu0 %v629_v56 }
  0xa0   :  { %634 = vmatprep.subr.bf16.mxu0 %v633_v59 }
  0xa2   :  { %612 = vmatpush3.bf16.msra.mxu1 %v609_v34 }
  0xa3   :  { %636 = vmatpush3.bf16.msra.mxu0 %v633_v59 }
  0xa4   :  { %638 = vmatprep.subr.bf16.mxu0 %v637_v63 }
  0xa7   :  { %640 = vmatpush3.bf16.msra.mxu0 %v637_v63 }
  0xa8   :  { %642 = vmatprep.subr.bf16.mxu0 %v641_v1 }
  0xab   :  { %644 = vmatpush3.bf16.msra.mxu0 %v641_v1 }
 0x161   :  { %v498_v48 = vpop.f32.mrb[0].mxu0 }
 0x162   :  { %v210_v49 = vadd.f32 %v498_v48, %v435_v47  ;;  %v204_v50 = vpop.f32.mrb[1].mxu0 }
 0x163   :  { %v205_v51 = vadd.f32 %v435_v47, %v204_v50 }
 0x165   :  { %655 = vtanh.f32 %v205_v51 }
 0x166   :  { %657 = vtanh.f32 %v210_v49 }
 0x16f   :  { %v656_v52 = vpop.eup %655 }
 0x170   :  { %v658_v53 = vpop.eup %657  ;;  %531 = vmatprep.mubr.f32.mxu1 %v656_v52 }
 0x171   :  { %532 = vmatmul.mubr.f32.vlgmr.msra.gmra.mrb[0].mxu1 %v658_v53 }
 0x244   :  { %v533_v3 = vpop.f32.mrb[0].mxu1 }
 0x245   :  { %v310_v4 = vadd.f32 %v533_v3, %v438_v2  ;;  %v304_v5 = vpop.f32.mrb[1].mxu1 }
 0x246   :  { %v305_v6 = vadd.f32 %v438_v2, %v304_v5 }
 0x248   :  { %659 = vtanh.f32 %v305_v6 }
 0x249   :  { %661 = vtanh.f32 %v310_v4 }
 0x252   :  { %v660_v7 = vpop.eup %659 }
 0x253   :  { %v662_v8 = vpop.eup %661  ;;  %566 = vmatprep.mubr.f32.mxu0 %v660_v7 }
 0x254   :  { %567 = vmatmul.mubr.f32.vlgmr.msra.gmra.mrb[2].mxu0 %v662_v8 }
 0x327   :  { %v568_v10 = vpop.f32.mrb[2].mxu0 }
 0x328   :  { %v410_v11 = vadd.f32 %v568_v10, %v439_v9  ;;  %v404_v12 = vpop.f32.mrb[3].mxu0 }
 0x329   :  { %v405_v13 = vadd.f32 %v439_v9, %v404_v12 }
 0x32a   :  { %414 = vst [vmem:[#allocation14 + $0x8] sm:$0xff] %v410_v11 }
 0x32b   :  { %413 = vst [vmem:[#allocation14] sm:$0xff] %v405_v13 }
 0x32c   :  { %828 = shalt.err (!%p825_p4)
}
 0x32d   :  { %s829_s19 = scalar_lea.hbm %s1033_s7, 256 }
 0x32e   :  { %p830_p5 = scmp.ne.s32.totalorder %s1033_s7, %s829_s19  ;;  %p833_p6 = scmp.lt.u32.totalorder %s829_s19, %s1033_s7 }
 0x330   :  { %p835_p7 = pnand %p833_p6, %p830_p5 }
 0x332   :  { %838 = shalt.err (!%p835_p7)
}
 0x333   :  { %426 = dma.vmem_to_hbm [thread:$0]  %s421_s30, 256, %s1033_s7, [#allocation4], %s851_s13, %s851_s13, %s852_s14  }
 0x334   :  { %847 = dma.done.wait [#allocation4], 256  }
 0x335   :  { %848 = vsyncadd [#allocation4], 4294967040 }
 0x336   :  { %430 = vsyncpa [#allocation3], 1 }
 0x337   :  { %431 = vsyncpa [#allocation6], 1 }
 0x338   :  { %432 = vsyncpa [#allocation9], 1 }
 0x339   :  { %433 = vsyncpa [#allocation12], 1 }
 0x33a   :  { %434 = vsyncpa [#allocation4], 1 }

</bundles_post_ra>
